<compile_context>
chip_gen: v5e
topology: v5e:2x2
jax: 0.10.0
libtpu: 0.0.40
codegen_flags: <defaults>
</compile_context>

<pallas_src>
import jax
import jax.numpy as jnp
from jax.experimental import pallas as pl
from jax.experimental.pallas import tpu as pltpu


EPS = 1e-6


def _layernorm_kernel(x_ref, w_ref, b_ref, o_ref):
    # x_ref: (TM, D) tile of tokens; w_ref/b_ref: (1, D) f32 params (pre-cast in wrapper).
    x = x_ref[...].astype(jnp.float32)
    mean = jnp.mean(x, axis=-1, keepdims=True)
    xc = x - mean
    var = jnp.mean(xc * xc, axis=-1, keepdims=True)   # biased variance (torch LayerNorm)
    inv = jax.lax.rsqrt(var + EPS)
    o_ref[...] = (xc * inv * w_ref[...] + b_ref[...]).astype(o_ref.dtype)


def _round_up(x, m):
    return ((x + m - 1) // m) * m


def _device_kind():
    try:
        return (getattr(jax.devices()[0], "device_kind", "") or "").lower()
    except Exception:
        return ""


def _chip_config():
    """Generation-aware (footprint budget, scoped VMEM limit, #TensorCores/chip)."""
    kind = _device_kind()
    if "v7" in kind:
        # v7x: 64 MiB VMEM per TC, 2 TCs per chip -> keep the resident
        # 2x-in + 2x-out footprint around 16 MiB and the scoped limit at 32 MiB.
        return 16 * 1024 * 1024, 32 * 1024 * 1024, 2
    # v5e / v6e: 128 MiB physical VMEM, 1 TC -> larger tiles are safe; raising
    # vmem_limit_bytes is required on v5e (16 MiB default scoped limit).
    return 32 * 1024 * 1024, 64 * 1024 * 1024, 1


def _choose_tm(rows, D, itemsize, budget_bytes, n_cores):
    """Row-tile size: as large as the VMEM budget allows, balanced across cores."""
    # sublane packing: 8 rows for 4-byte dtypes, 16 for bf16, 32 for int8
    pack = max(8, 32 // max(itemsize, 1))
    # resident bytes per row: double-buffered input tile + double-buffered output tile
    per_row_bytes = 4 * D * itemsize
    tm = budget_bytes // max(per_row_bytes, 1)
    if n_cores > 1:
        # keep at least one block per core when the row count allows it
        balanced = _round_up((rows + n_cores - 1) // n_cores, pack)
        tm = min(tm, max(balanced, pack))
    tm = min(tm, _round_up(rows, pack))
    tm = max((tm // pack) * pack, pack)
    return tm


def encoder_forward(hidden_states, weight, bias):
    """Pallas implementation of Encoder.forward: LayerNorm(hidden_states, eps=1e-6)."""
    B, N, D = hidden_states.shape
    rows = B * N
    x2d = hidden_states.reshape(rows, D)
    itemsize = jnp.dtype(hidden_states.dtype).itemsize

    budget_bytes, vmem_limit_bytes, n_cores = _chip_config()
    tm = _choose_tm(rows, D, itemsize, budget_bytes, n_cores)
    grid = (pl.cdiv(rows, tm),)   # partial trailing block is masked by Pallas (no pad/slice)

    # Hoist the f32 cast of the params out of the kernel (done once here).
    w2d = weight.astype(jnp.float32).reshape(1, D)
    b2d = bias.astype(jnp.float32).reshape(1, D)

    # On v7x only CORE_PARALLEL actually splits the grid across both TCs;
    # on single-TC chips "parallel" is equivalent and always safe.
    if n_cores > 1:
        row_sem = getattr(pltpu, "CORE_PARALLEL", "parallel")
    else:
        row_sem = "parallel"

    out = pl.pallas_call(
        _layernorm_kernel,
        out_shape=jax.ShapeDtypeStruct((rows, D), hidden_states.dtype),
        grid_spec=pltpu.PrefetchScalarGridSpec(
            num_scalar_prefetch=0,
            grid=grid,
            in_specs=[
                pl.BlockSpec((tm, D), lambda i: (i, 0)),   # x tile
                pl.BlockSpec((1, D), lambda i: (0, 0)),    # weight (resident, same block every step)
                pl.BlockSpec((1, D), lambda i: (0, 0)),    # bias
            ],
            out_specs=pl.BlockSpec((tm, D), lambda i: (i, 0)),
        ),
        compiler_params=pltpu.CompilerParams(
            dimension_semantics=(row_sem,),
            vmem_limit_bytes=vmem_limit_bytes,
        ),
    )(x2d, w2d, b2d)

    return out.reshape(B, N, D)


def _reference(hidden_states, weight, bias):
    x = hidden_states.astype(jnp.float32)
    mean = jnp.mean(x, axis=-1, keepdims=True)
    var = jnp.mean((x - mean) ** 2, axis=-1, keepdims=True)
    y = (x - mean) / jnp.sqrt(var + EPS) * weight + bias
    return y.astype(hidden_states.dtype)


if __name__ == "__main__":
    key = jax.random.PRNGKey(0)
    D = 128              # hidden_size (lane-aligned)
    k_x, k_w, k_b, k_x2 = jax.random.split(key, 4)

    # PyTorch LayerNorm default init (weight=1, bias=0) plus a small deterministic
    # perturbation so scale/shift are actually exercised.
    weight = jnp.ones((D,), jnp.float32) + 0.01 * jax.random.normal(k_w, (D,), jnp.float32)
    bias = 0.01 * jax.random.normal(k_b, (D,), jnp.float32)

    # Case 1: square-seq input like the PyTorch forward assumes (N = H*W).
    B, H, W = 2, 4, 4
    N = H * W
    hidden_states = jax.random.normal(k_x, (B, N, D), dtype=jnp.float32)
    out = jax.block_until_ready(encoder_forward(hidden_states, weight, bias))
    ref = _reference(hidden_states, weight, bias)
    assert out.shape == (B, N, D)
    assert jnp.allclose(out, ref, atol=1e-5, rtol=1e-5), "mismatch vs reference LayerNorm"

    # Case 2: token count not a multiple of the sublane pack / row tile
    # (exercises the masked partial trailing block — no pad/slice in the wrapper).
    B2, N2 = 2, 3
    hidden_states2 = jax.random.normal(k_x2, (B2, N2, D), dtype=jnp.float32)
    out2 = jax.block_until_ready(encoder_forward(hidden_states2, weight, bias))
    ref2 = _reference(hidden_states2, weight, bias)
    assert out2.shape == (B2, N2, D)
    assert jnp.allclose(out2, ref2, atol=1e-5, rtol=1e-5), "mismatch vs reference (partial block path)"

    # TODO(synk): VSSBlock layers are instantiated in Encoder.__init__ but never
    # invoked in Encoder.forward, so they are intentionally not implemented.
    print("KERNEL_OK")
</pallas_src>

<mosaic_0001>
module attributes {stable_mosaic.version = 11 : i64} {
  func.func @_layernorm_kernel(%arg0: i32, %arg1: memref<32x128xf32, #tpu.memory_space<vmem>>, %arg2: memref<1x128xf32, #tpu.memory_space<vmem>>, %arg3: memref<1x128xf32, #tpu.memory_space<vmem>>, %arg4: memref<32x128xf32, #tpu.memory_space<vmem>>) attributes {dimension_semantics = [#tpu.dimension_semantics<parallel>], iteration_bounds = array<i64: 1>, scalar_prefetch = 0 : i64, scratch_operands = 0 : i64, tpu.core_type = #tpu.core_type<tc>, window_params = [{transform_indices = @transform_0, window_bounds = array<i64: 32, 128>}, {pipeline_mode = #tpu.pipeline_mode<synchronous>, transform_indices = @transform_1, window_bounds = array<i64: 1, 128>}, {pipeline_mode = #tpu.pipeline_mode<synchronous>, transform_indices = @transform_2, window_bounds = array<i64: 1, 128>}, {transform_indices = @transform_3, window_bounds = array<i64: 32, 128>}]} {
    %c0 = arith.constant 0 : index
    %c0_0 = arith.constant 0 : index
    %0 = vector.load %arg1[%c0, %c0_0] : memref<32x128xf32, #tpu.memory_space<vmem>>, vector<32x128xf32>
    %cst = arith.constant dense<0.000000e+00> : vector<32xf32>
    %1 = vector.multi_reduction <add>, %0, %cst [1] : vector<32x128xf32> to vector<32xf32>
    %2 = vector.shape_cast %1 : vector<32xf32> to vector<32x1xf32>
    %cst_1 = arith.constant 1.280000e+02 : f32
    %3 = vector.broadcast %cst_1 : f32 to vector<32x1xf32>
    %4 = arith.divf %2, %3 : vector<32x1xf32>
    %5 = vector.broadcast %4 : vector<32x1xf32> to vector<32x128xf32>
    %6 = arith.subf %0, %5 : vector<32x128xf32>
    %7 = arith.mulf %6, %6 : vector<32x128xf32>
    %cst_2 = arith.constant dense<0.000000e+00> : vector<32xf32>
    %8 = vector.multi_reduction <add>, %7, %cst_2 [1] : vector<32x128xf32> to vector<32xf32>
    %9 = vector.shape_cast %8 : vector<32xf32> to vector<32x1xf32>
    %cst_3 = arith.constant 1.280000e+02 : f32
    %10 = vector.broadcast %cst_3 : f32 to vector<32x1xf32>
    %11 = arith.divf %9, %10 : vector<32x1xf32>
    %cst_4 = arith.constant 9.99999997E-7 : f32
    %12 = vector.broadcast %cst_4 : f32 to vector<32x1xf32>
    %13 = arith.addf %11, %12 : vector<32x1xf32>
    %14 = math.rsqrt %13 : vector<32x1xf32>
    %15 = vector.broadcast %14 : vector<32x1xf32> to vector<32x128xf32>
    %16 = arith.mulf %6, %15 : vector<32x128xf32>
    %c0_5 = arith.constant 0 : index
    %c0_6 = arith.constant 0 : index
    %17 = vector.load %arg2[%c0_5, %c0_6] : memref<1x128xf32, #tpu.memory_space<vmem>>, vector<1x128xf32>
    %18 = vector.broadcast %17 : vector<1x128xf32> to vector<32x128xf32>
    %19 = arith.mulf %16, %18 : vector<32x128xf32>
    %c0_7 = arith.constant 0 : index
    %c0_8 = arith.constant 0 : index
    %20 = vector.load %arg3[%c0_7, %c0_8] : memref<1x128xf32, #tpu.memory_space<vmem>>, vector<1x128xf32>
    %21 = vector.broadcast %20 : vector<1x128xf32> to vector<32x128xf32>
    %22 = arith.addf %19, %21 : vector<32x128xf32>
    %c0_9 = arith.constant 0 : index
    %c0_10 = arith.constant 0 : index
    %23 = vector.load %arg4[%c0_9, %c0_10] : memref<32x128xf32, #tpu.memory_space<vmem>>, vector<32x128xf32>
    tpu.vector_store %arg4[%c0_9, %c0_10], %22 {strides = array<i32>} : memref<32x128xf32, #tpu.memory_space<vmem>>, vector<32x128xf32>,
    return
  }
  func.func @transform_0(%arg0: i32) -> (i32, i32) {
    %c0_i32 = arith.constant 0 : i32
    %c0_i32_0 = arith.constant 0 : i32
    return %arg0, %c0_i32 : i32, i32
  }
  func.func @transform_1(%arg0: i32) -> (i32, i32) {
    %c0_i32 = arith.constant 0 : i32
    %c0_i32_0 = arith.constant 0 : i32
    %c0_i32_1 = arith.constant 0 : i32
    return %c0_i32, %c0_i32_0 : i32, i32
  }
  func.func @transform_2(%arg0: i32) -> (i32, i32) {
    %c0_i32 = arith.constant 0 : i32
    %c0_i32_0 = arith.constant 0 : i32
    %c0_i32_1 = arith.constant 0 : i32
    return %c0_i32, %c0_i32_0 : i32, i32
  }
  func.func @transform_3(%arg0: i32) -> (i32, i32) {
    %c0_i32 = arith.constant 0 : i32
    %c0_i32_0 = arith.constant 0 : i32
    return %arg0, %c0_i32 : i32, i32
  }
}

</mosaic_0001>

<bundles_post_ra>
// kernel: tpu_custom_call.1
= control target key start
LH: loop header
LB: loop body
LE: loop exit
PB: predicated region body
PF: predicated region fallthrough
CT: control target
= control target key end

     0   :  { %8 = vsyncpa [#allocation3], 0  ;;  %s326_s0 = inlined_call_operand.hbm [shape: f32[32,128], index: 0, kind: input, shape index: {}]   ;;  %s327_s1 = inlined_call_operand.hbm [shape: f32[1,128], index: 1, kind: input, shape index: {}]   ;;  %s328_s2 = inlined_call_operand.vmem [shape: f32[1,128], index: 2, kind: input, shape index: {}]   ;;  %s329_s3 = inlined_call_operand.hbm [shape: f32[32,128], index: 3, kind: output, shape index: {}]  }
   0x1   :  { %9 = vsyncpa [#allocation6], 0 }
   0x2   :  { %10 = vsyncpa [#allocation4], 0  ;;  %s15_s14 = sshll.u32 %s326_s0, 4  ;;  %s272_s15 = smov [#allocation2]   ;;  %s16_s14 = int_to_ptr.hbm [resolvable:$true] %s15_s14 }
   0x3   :  { %s17_s16 = sshll.u32 %s272_s15, 4  ;;  %s29_s19 = sshll.u32 %s327_s1, 4  ;;  %s18_s16 = int_to_ptr.vmem [resolvable:$true] %s17_s16  ;;  %s30_s19 = int_to_ptr.hbm [resolvable:$true] %s29_s19 }
   0x4   :  { %s273_s20 = smov 128   ;;  %s274_s21 = smov 8  }
   0x5   :  { %23 = dma.hbm_to_vmem [thread:$0]  %s16_s14, 512, %s18_s16, [#allocation3], %s273_s20, %s273_s20, %s274_s21  }
   0x6   :  { %s275_s22 = smov [#allocation5]  }
   0x7   :  { %s31_s23 = sshll.u32 %s275_s22, 4  ;;  %s32_s23 = int_to_ptr.vmem [resolvable:$true] %s31_s23 }
   0x8   :  { %34 = dma.hbm_to_vmem [thread:$0]  %s30_s19, 16, %s32_s23, [#allocation6]  }
   0x9   :  { %266 = dma.done.wait [#allocation3], 512  }
   0xa   :  { %267 = vsyncadd [#allocation3], 4294966784 }
   0xb   :  { %268 = dma.done.wait [#allocation6], 16  }
   0xc   :  { %269 = vsyncadd [#allocation6], 4294967280  ;;  %v47_v0 = vld [vmem:[#allocation2 + $0x10] sm:$0xff]  ;;  %v45_v1 = vld [vmem:[#allocation2] sm:$0xff]  ;;  %v276_v4 = vmov 128.0   ;;  %s162_s27 = sshll.u32 %s329_s3, 4  ;;  %s163_s27 = int_to_ptr.hbm [resolvable:$true] %s162_s27 }
   0xd   :  { %53 = vadd.xlane.f32.xlu1 %v47_v0  ;;  %49 = vadd.xlane.f32.xlu0 %v45_v1  ;;  %v48_v2 = vld [vmem:[#allocation2 + $0x18] sm:$0xff]  ;;  %v46_v3 = vld [vmem:[#allocation2 + $0x8] sm:$0xff]  ;;  %184 = vrcp.f32 %v276_v4  ;;  %v182_v53 = vld [vmem:[#allocation5] ss:$0 sm:$0xff] }
   0xe   :  { %v183_v61 = vld [vmem:[%s328_s2] ss:$0 sm:$0xff]  ;;  %s277_s2 = smov [#allocation7]  }
   0xf   :  { %s160_s24 = sshll.u32 %s277_s2, 4  ;;  %s161_s24 = int_to_ptr.vmem [resolvable:$true] %s160_s24 }
  0x13   :  { %v185_v5 = vpop.eup %184 }
  0x14   :  { %v58_v6 = vmul.f32 128.0, %v185_v5  ;;  %vm62_vm0 = vweird.f32 %v185_v5 }
  0x15   :  { %55 = vadd.xlane.f32.xlu1 %v48_v2  ;;  %51 = vadd.xlane.f32.xlu0 %v46_v3 }
  0x16   :  { %v59_v7 = vsub.f32 1.0, %v58_v6 }
  0x18   :  { %v60_v8 = vmul.f32 %v185_v5, %v59_v7 }
  0x1a   :  { %v61_v9 = vadd.f32 %v185_v5, %v60_v8 }
  0x1c   :  { %v63_v10 = vsel %vm62_vm0, %v185_v5, %v61_v9 }
  0x80   :  { %v54_v11 = vpop.xlane.xlu1 %53  ;;  %v50_v12 = vpop.xlane.xlu0 %49 }
  0x81   :  { %v66_v13 = vmul.f32 %v63_v10, %v54_v11  ;;  %v64_v14 = vmul.f32 %v63_v10, %v50_v12 }
  0x83   :  { %v70_v15 = vsub.f32 %v47_v0, %v66_v13  ;;  %v68_v16 = vsub.f32 %v45_v1, %v64_v14 }
  0x85   :  { %v74_v17 = vmul.f32 %v70_v15, %v70_v15  ;;  %v72_v18 = vmul.f32 %v68_v16, %v68_v16 }
  0x87   :  { %80 = vadd.xlane.f32.xlu0 %v74_v17  ;;  %76 = vadd.xlane.f32.xlu2 %v72_v18 }
  0x88   :  { %v56_v19 = vpop.xlane.xlu1 %55  ;;  %v52_v20 = vpop.xlane.xlu0 %51 }
  0x89   :  { %v67_v21 = vmul.f32 %v63_v10, %v56_v19  ;;  %v65_v22 = vmul.f32 %v63_v10, %v52_v20 }
  0x8b   :  { %v307_v23 = vsub.f32 %v48_v2, %v67_v21  ;;  %v309_v24 = vsub.f32 %v46_v3, %v65_v22 }
  0x8d   :  { %v75_v25 = vmul.f32 %v307_v23, %v307_v23  ;;  %v73_v26 = vmul.f32 %v309_v24, %v309_v24 }
  0x8f   :  { %82 = vadd.xlane.f32.xlu1 %v75_v25  ;;  %78 = vadd.xlane.f32.xlu2 %v73_v26 }
  0xfa   :  { %v77_v27 = vpop.xlane.xlu2 %76  ;;  %v81_v28 = vpop.xlane.xlu0 %80 }
  0xfb   :  { %v84_v29 = vmul.f32 %v77_v27, %v63_v10  ;;  %v86_v30 = vmul.f32 %v81_v28, %v63_v10 }
  0xfd   :  { %v88_v31 = vadd.f32 1e-06, %v84_v29  ;;  %v90_v32 = vadd.f32 1e-06, %v86_v30 }
  0xff   :  { %186 = vrsqrt.f32 %v88_v31  ;;  %vm98_vm3 = vweird.f32 %v88_v31  ;;  %vm118_vm5 = vweird.f32 %v90_v32 }
 0x100   :  { %188 = vrsqrt.f32 %v90_v32 }
 0x102   :  { %v83_v33 = vpop.xlane.xlu1 %82  ;;  %v79_v34 = vpop.xlane.xlu2 %78 }
 0x103   :  { %v87_v35 = vmul.f32 %v83_v33, %v63_v10  ;;  %v85_v36 = vmul.f32 %v79_v34, %v63_v10 }
 0x105   :  { %v187_v37 = vpop.eup %186  ;;  %v91_v38 = vadd.f32 1e-06, %v87_v35  ;;  %v89_v39 = vadd.f32 1e-06, %v85_v36 }
 0x106   :  { %v189_v40 = vpop.eup %188  ;;  %v93_v41 = vmul.f32 %v187_v37, %v88_v31  ;;  %vm99_vm1 = vweird.f32 %v187_v37 }
 0x107   :  { %v113_v42 = vmul.f32 %v189_v40, %v90_v32  ;;  %190 = vrsqrt.f32 %v91_v38  ;;  %vm119_vm2 = vweird.f32 %v189_v40  ;;  %vm100_vm4 = vmor %vm98_vm3, %vm99_vm1  ;;  %vm128_vm9 = vweird.f32 %v91_v38 }
 0x108   :  { %v94_v43 = vmul.f32 %v187_v37, %v93_v41  ;;  %192 = vrsqrt.f32 %v89_v39  ;;  %vm120_vm6 = vmor %vm118_vm5, %vm119_vm2  ;;  %vm108_vm11 = vweird.f32 %v89_v39 }
 0x109   :  { %v114_v44 = vmul.f32 %v189_v40, %v113_v42 }
 0x10a   :  { %v95_v45 = vmul.f32 0.5, %v94_v43 }
 0x10b   :  { %v115_v46 = vmul.f32 0.5, %v114_v44 }
 0x10c   :  { %v96_v47 = vsub.f32 1.5, %v95_v45 }
 0x10d   :  { %v191_v48 = vpop.eup %190  ;;  %v116_v49 = vsub.f32 1.5, %v115_v46 }
 0x10e   :  { %v193_v50 = vpop.eup %192  ;;  %v97_v51 = vmul.f32 %v187_v37, %v96_v47  ;;  %v123_v52 = vmul.f32 %v191_v48, %v91_v38  ;;  %vm129_vm7 = vweird.f32 %v191_v48 }
 0x10f   :  { %v117_v54 = vmul.f32 %v189_v40, %v116_v49  ;;  %v103_v55 = vmul.f32 %v193_v50, %v89_v39  ;;  %vm109_vm8 = vweird.f32 %v193_v50  ;;  %vm130_vm10 = vmor %vm128_vm9, %vm129_vm7 }
 0x110   :  { %v101_v56 = vsel %vm100_vm4, %v187_v37, %v97_v51  ;;  %v124_v57 = vmul.f32 %v191_v48, %v123_v52  ;;  %vm110_vm12 = vmor %vm108_vm11, %vm109_vm8 }
 0x111   :  { %v132_v58 = vmul.f32 %v101_v56, %v68_v16  ;;  %v121_v59 = vsel %vm120_vm6, %v189_v40, %v117_v54  ;;  %v104_v60 = vmul.f32 %v193_v50, %v103_v55 }
 0x112   :  { %v134_v62 = vmul.f32 %v121_v59, %v70_v15  ;;  %v125_v63 = vmul.f32 0.5, %v124_v57 }
 0x113   :  { %v140_v0 = vmul.f32 %v182_v53, %v132_v58  ;;  %v105_v1 = vmul.f32 0.5, %v104_v60 }
 0x114   :  { %v142_v2 = vmul.f32 %v182_v53, %v134_v62  ;;  %v126_v3 = vsub.f32 1.5, %v125_v63 }
 0x115   :  { %v106_v4 = vsub.f32 1.5, %v105_v1  ;;  %v148_v5 = vadd.f32 %v183_v61, %v140_v0 }
 0x116   :  { %v127_v6 = vmul.f32 %v191_v48, %v126_v3  ;;  %v150_v7 = vadd.f32 %v183_v61, %v142_v2 }
 0x117   :  { %v107_v8 = vmul.f32 %v193_v50, %v106_v4  ;;  %152 = vst [vmem:[#allocation7] sm:$0xff] %v148_v5 }
 0x118   :  { %v131_v9 = vsel %vm130_vm10, %v191_v48, %v127_v6  ;;  %154 = vst [vmem:[#allocation7 + $0x10] sm:$0xff] %v150_v7 }
 0x119   :  { %v135_v10 = vmul.f32 %v131_v9, %v307_v23  ;;  %v111_v11 = vsel %vm110_vm12, %v193_v50, %v107_v8 }
 0x11a   :  { %v133_v12 = vmul.f32 %v111_v11, %v309_v24 }
 0x11b   :  { %v143_v13 = vmul.f32 %v182_v53, %v135_v10 }
 0x11c   :  { %v141_v14 = vmul.f32 %v182_v53, %v133_v12 }
 0x11d   :  { %v151_v15 = vadd.f32 %v183_v61, %v143_v13 }
 0x11e   :  { %v149_v16 = vadd.f32 %v183_v61, %v141_v14 }
 0x11f   :  { %155 = vst [vmem:[#allocation7 + $0x18] sm:$0xff] %v151_v15 }
 0x120   :  { %153 = vst [vmem:[#allocation7 + $0x8] sm:$0xff] %v149_v16 }
 0x121   :  { %168 = dma.vmem_to_hbm [thread:$0]  %s161_s24, 512, %s163_s27, [#allocation4], %s273_s20, %s273_s20, %s274_s21  }
 0x122   :  { %270 = dma.done.wait [#allocation4], 512  }
 0x123   :  { %271 = vsyncadd [#allocation4], 4294966784 }
 0x124   :  { %173 = vsyncpa [#allocation3], 1 }
 0x125   :  { %174 = vsyncpa [#allocation6], 1 }
 0x126   :  { %175 = vsyncpa [#allocation4], 1 }

</bundles_post_ra>
